<compile_context>
chip_gen: v5e
topology: v5e:2x2
jax: 0.10.0
libtpu: 0.0.40
codegen_flags: <defaults>
</compile_context>

<pallas_src>
import math

import jax
import jax.numpy as jnp
from jax import lax
from jax.experimental import pallas as pl
from jax.experimental.pallas import tpu as pltpu


def _round_up(x, m):
    return (x + m - 1) // m * m


def _cdiv(a, b):
    return (a + b - 1) // b


def _tpu_generation_info():
    """Returns (physical VMEM bytes, looks-like-v7x), with safe fallbacks."""
    vmem = 128 * 2**20
    try:
        vmem = int(pltpu.get_tpu_info().vmem_capacity_bytes)
    except Exception:
        pass
    kind = ""
    try:
        kind = jax.devices()[0].device_kind.lower()
    except Exception:
        pass
    # v7x: 64 MiB VMEM per TensorCore and 2 TCs/chip (vs 128 MiB / 1 TC on
    # v5e/v6e).  Detect via device_kind string, with VMEM size as a fallback.
    is_v7x = ("v7" in kind) or ("7x" in kind) or (vmem <= 80 * 2**20)
    return vmem, is_v7x


# ----------------------------------------------------------------------------
# Pallas kernel: tiled GEMM (+ bias) in the Cout-on-sublanes orientation.
#   W        (Co_pad8, tile_k)   fused conv weights, bf16 (resident over M)
#   patchesT (tile_k, tile_m)    im2col patches, K-major, bf16
#   bias     (Co_pad8, 1)        f32
#   out      (Co_pad8, tile_m)   f32 accumulation in VMEM scratch
# ----------------------------------------------------------------------------
def _gemm_bias_kernel(w_ref, x_ref, b_ref, o_ref, acc_ref):
    k = pl.program_id(1)

    @pl.when(k == 0)
    def _init():
        # Accumulator starts at the broadcast bias (one hoisted broadcast,
        # no separate epilogue add over the tile).
        acc_ref[...] = jnp.broadcast_to(b_ref[...], acc_ref.shape)

    acc_ref[...] += jnp.dot(
        w_ref[...], x_ref[...], preferred_element_type=jnp.float32
    )

    @pl.when(k == pl.num_programs(1) - 1)
    def _store():
        o_ref[...] = acc_ref[...].astype(o_ref.dtype)


def _choose_tiles(M, K, budget_bytes, co_pad, out_itemsize, min_m_steps):
    """Pick (tile_m, tile_k, K_pad, nk) against a generation-aware budget.

    tile_m = largest candidate fitting the budget (per review: no artificial
    shrink loop; the grid is a serial loop on v5e/v6e, so fewer/bigger M steps
    win on a bandwidth-bound GEMM).  min_m_steps>1 only on v7x (2 TCs).
    """
    MAX_TILE_K = 2048
    if K <= MAX_TILE_K:
        tile_k, nk = K, 1          # single full-extent K tile, zero K padding
    else:
        nk = _cdiv(K, MAX_TILE_K)  # 128-multiple closest to cdiv(K, nk)
        tile_k = _round_up(_cdiv(K, nk), 128)
    K_pad = tile_k * nk

    def working_set(tm):
        return (2 * tile_k * tm * 2            # bf16 patches tile, dbl-buffered
                + 2 * co_pad * tile_k * 2      # bf16 weight tile, dbl-buffered
                + 2 * co_pad * tm * out_itemsize  # output tile, dbl-buffered
                + co_pad * tm * 4              # f32 accumulator scratch
                + co_pad * 4)                  # bias

    m_cap = _round_up(M, 128)
    tile_m = min(128, m_cap)
    for cand in (4096, 2048, 1024, 512, 256, 128):
        c = min(cand, m_cap)
        if working_set(c) <= budget_bytes:
            tile_m = c
            break
    # v7x only: make sure both TensorCores get an M step.
    if min_m_steps > 1 and m_cap > 128:
        while tile_m > 128 and _cdiv(M, tile_m) < min_m_steps:
            tile_m = max(128, _round_up(tile_m // 2, 128))
    return tile_m, tile_k, K_pad, nk


def pallas_conv2d_nchw(x_nchw, kernel_oihw, bias_vec, stride, padding):
    """conv2d with NCHW input / OIHW weights; conv FLOPs run in a Pallas GEMM."""
    N, Cin, H, W = x_nchw.shape
    Cout, Cin_w, S, S2 = kernel_oihw.shape
    assert Cin == Cin_w and S == S2
    P = padding
    Ho = (H + 2 * P - S) // stride + 1
    Wo = (W + 2 * P - S) // stride + 1
    M = N * Ho * Wo
    K = S * S * Cin
    out_dtype = x_nchw.dtype
    out_itemsize = jnp.dtype(out_dtype).itemsize

    # ---- layout / dtype glue (plain JAX) -----------------------------------
    # bf16 activations (halves HBM traffic); f32 accumulation in-kernel.
    x_pad = jnp.pad(x_nchw.astype(jnp.bfloat16),
                    ((0, 0), (0, 0), (P, P), (P, P)))

    # im2col, K-MAJOR (K on sublanes, M on lanes).  Column order along K is
    # (ky, kx, ci), matching the fused weight reshape below.  Stride is
    # handled here (wrapper-side decimation), never by strided in-kernel
    # slices.
    # TODO(synk): for production image sizes, build these patches in VMEM
    # inside the kernel from halo'd row tiles (memory_space=pl.ANY + manual
    # DMA) to avoid the S^2 activation re-read from HBM; at these channel
    # counts the wrapper-side build keeps the hot loop a single MXU GEMM.
    slabs = []
    for ky in range(S):
        for kx in range(S):
            slabs.append(
                lax.slice(
                    x_pad,
                    (0, 0, ky, kx),
                    (N, Cin, ky + (Ho - 1) * stride + 1,
                     kx + (Wo - 1) * stride + 1),
                    (1, 1, stride, stride),
                )  # (N, Cin, Ho, Wo)
            )
    patchesT = (jnp.stack(slabs, axis=0)       # (S*S, N, Cin, Ho, Wo)
                .transpose(0, 2, 1, 3, 4)      # (S*S, Cin, N, Ho, Wo)
                .reshape(K, M))                # (K, M)  K-major

    # ---- tiling / padding ---------------------------------------------------
    vmem_bytes, is_v7x = _tpu_generation_info()
    # Generation-aware VMEM budget for the double-buffered working set.
    budget = (24 * 2**20) if is_v7x else (28 * 2**20)
    co_pad = _round_up(Cout, 8)                # sublane pad only (not 128)
    tile_m, tile_k, K_pad, nk = _choose_tiles(
        M, K, budget, co_pad, out_itemsize, min_m_steps=2 if is_v7x else 1)
    M_pad = _round_up(M, tile_m)
    nm = M_pad // tile_m

    # Only pad when a remainder actually exists (no full extra HBM copy for
    # aligned shapes like the demo's).
    if M_pad > M or K_pad > K:
        patchesT = jnp.pad(patchesT, ((0, K_pad - K), (0, M_pad - M)))

    # Fused 2-D weight (co_pad, K_pad), K order (ky, kx, ci) — tiny, resident
    # across all M steps (constant index map).
    w2 = (jnp.transpose(kernel_oihw, (0, 2, 3, 1))
          .reshape(Cout, K).astype(jnp.bfloat16))
    if co_pad > Cout or K_pad > K:
        w2 = jnp.pad(w2, ((0, co_pad - Cout), (0, K_pad - K)))
    b2 = (jnp.zeros((co_pad, 1), jnp.float32)
          .at[:Cout, 0].set(bias_vec.astype(jnp.float32)))

    # ---- VMEM limit (generation-aware, ~2x the real working set) -----------
    need = (2 * tile_k * tile_m * 2
            + 2 * co_pad * tile_k * 2
            + 2 * co_pad * tile_m * out_itemsize
            + co_pad * tile_m * 4
            + co_pad * 4)
    cap = (24 * 2**20) if is_v7x else (48 * 2**20)
    vmem_limit = int(min(max(2 * need, 8 * 2**20), cap))

    flops = 2 * M * K * Cout
    bytes_accessed = int(patchesT.size * 2 + w2.size * 2 + b2.size * 4
                         + co_pad * M_pad * out_itemsize)

    out = pl.pallas_call(
        _gemm_bias_kernel,
        out_shape=jax.ShapeDtypeStruct((co_pad, M_pad), out_dtype),
        grid_spec=pltpu.PrefetchScalarGridSpec(
            num_scalar_prefetch=0,
            grid=(nm, nk),
            in_specs=[
                pl.BlockSpec((co_pad, tile_k), lambda i, k: (0, k)),
                pl.BlockSpec((tile_k, tile_m), lambda i, k: (k, i)),
                pl.BlockSpec((co_pad, 1), lambda i, k: (0, 0)),
            ],
            out_specs=pl.BlockSpec((co_pad, tile_m), lambda i, k: (0, i)),
            scratch_shapes=[pltpu.VMEM((co_pad, tile_m), jnp.float32)],
        ),
        compiler_params=pltpu.CompilerParams(
            dimension_semantics=("parallel", "arbitrary"),
            vmem_limit_bytes=vmem_limit,
        ),
        cost_estimate=pl.CostEstimate(
            flops=flops, transcendentals=0, bytes_accessed=bytes_accessed
        ),
    )(w2, patchesT, b2)

    # Crop Cout/M padding; result is already (Cout, N*Ho*Wo) -> NCHW via one
    # tiny leading-dims swap.
    out = out[:Cout, :M].reshape(Cout, N, Ho, Wo)
    return jnp.transpose(out, (1, 0, 2, 3))


# ----------------------------------------------------------------------------
# conv_base module (parameter construction + forward), JAX side.
# ----------------------------------------------------------------------------
def kaiming_init(key, base, num_in, num_out):
    # f = sum(base*base) * num_in / base.shape[1]; weight = sqrt(1/f)*randn(...)
    f = jnp.sum(base * base) * num_in / base.shape[1]
    return jnp.sqrt(1.0 / f) * jax.random.normal(
        key, (num_in, num_out, base.shape[0]), dtype=jnp.float32
    )


class ConvBase:
    def __init__(self, key, base, num_in, num_out, stride, bias):
        self.base = base                               # (bases, Ro, Ri, S, S)
        self.bases = base.shape[0]
        self.size = base.shape[4]
        self.stride = stride
        self.dim_rep_in = base.shape[2]
        self.dim_rep_out = base.shape[1]
        self.num_in = num_in
        self.num_out = num_out
        kp, kb = jax.random.split(key)
        self.param = kaiming_init(kp, base, num_in, num_out)  # (num_in, num_out, bases)
        self.bias = None
        if bias:
            # The PyTorch module initializes bias to zeros; use small nonzero
            # values so the bias path is actually exercised.
            self.bias = 0.1 * jax.random.normal(kb, (num_out,), dtype=jnp.float32)
            self.a = jnp.ones((self.dim_rep_in,), dtype=jnp.float32)

    def materialize_kernel_and_bias(self):
        kernel = jnp.einsum("ijk,kmnpq->jminpq", self.param, self.base).reshape(
            self.num_out * self.dim_rep_out,
            self.num_in * self.dim_rep_in,
            self.size,
            self.size,
        )
        cout = self.num_out * self.dim_rep_out
        if self.bias is not None:
            # Exactly as the PyTorch module: einsum('i,j->ij', bias, a).reshape(-1).
            # `a` has length dim_rep_in, so conv2d only accepts this bias when
            # dim_rep_in == dim_rep_out (as in the spec's usage).
            bias = jnp.einsum("i,j->ij", self.bias, self.a).reshape(-1)
            assert bias.shape[0] == cout, (
                "conv_base bias path requires dim_rep_in == dim_rep_out")
        else:
            bias = jnp.zeros((cout,), jnp.float32)
        return kernel, bias

    def forward(self, x):
        kernel, bias = self.materialize_kernel_and_bias()
        pad = math.floor(self.size / 2)
        # Note: operands are rounded to bf16 and accumulated in f32 in-kernel;
        # output follows x.dtype.
        return pallas_conv2d_nchw(x, kernel, bias, self.stride, pad)


# ----------------------------------------------------------------------------
# Demo + correctness check.
# ----------------------------------------------------------------------------
if __name__ == "__main__":
    key = jax.random.PRNGKey(0)
    k_base, k_param, k_x = jax.random.split(key, 3)

    # Small, consistent shapes:
    #   base: (bases=6, dim_rep_out=2, dim_rep_in=2, S=3, S=3)
    #   num_in=2, num_out=3  ->  Cin = 4, Cout = 6
    #   x: (N=2, Cin=4, H=16, W=16), stride=1, bias=True
    bases, Ro, Ri, S = 6, 2, 2, 3
    num_in, num_out = 2, 3
    N, H, W = 2, 16, 16
    stride = 1

    base = jax.random.normal(k_base, (bases, Ro, Ri, S, S), dtype=jnp.float32)
    x = jax.random.normal(k_x, (N, num_in * Ri, H, W), dtype=jnp.float32)

    module = ConvBase(k_param, base, num_in, num_out, stride=stride, bias=True)
    out = jax.block_until_ready(module.forward(x))

    # Reference: same math with the same bf16-rounded operands and f32
    # accumulation (the Pallas kernel consumes bf16 inputs, accumulates in f32).
    kernel, bias = module.materialize_kernel_and_bias()
    ref = lax.conv_general_dilated(
        x.astype(jnp.bfloat16),
        kernel.astype(jnp.bfloat16),
        window_strides=(stride, stride),
        padding=[(S // 2, S // 2), (S // 2, S // 2)],
        dimension_numbers=("NCHW", "OIHW", "NCHW"),
        preferred_element_type=jnp.float32,
    ) + bias[None, :, None, None]

    assert out.shape == ref.shape, (out.shape, ref.shape)
    err = float(jnp.max(jnp.abs(out - ref)))
    assert jnp.allclose(out, ref, atol=1e-2, rtol=1e-2), err
    print("KERNEL_OK")
</pallas_src>

<mosaic_0001>
module attributes {stable_mosaic.version = 11 : i64} {
  func.func @_gemm_bias_kernel(%arg0: i32, %arg1: i32, %arg2: memref<8x36xbf16, #tpu.memory_space<vmem>>, %arg3: memref<36x512xbf16, #tpu.memory_space<vmem>>, %arg4: memref<8x1xf32, #tpu.memory_space<vmem>>, %arg5: memref<8x512xf32, #tpu.memory_space<vmem>>, %arg6: memref<8x512xf32, #tpu.memory_space<vmem>>) attributes {dimension_semantics = [#tpu.dimension_semantics<parallel>, #tpu.dimension_semantics<arbitrary>], iteration_bounds = array<i64: 1, 1>, scalar_prefetch = 0 : i64, scratch_operands = 1 : i64, tpu.core_type = #tpu.core_type<tc>, window_params = [{transform_indices = @transform_0, window_bounds = array<i64: 8, 36>}, {transform_indices = @transform_1, window_bounds = array<i64: 36, 512>}, {pipeline_mode = #tpu.pipeline_mode<synchronous>, transform_indices = @transform_2, window_bounds = array<i64: 8, 1>}, {transform_indices = @transform_3, window_bounds = array<i64: 8, 512>}]} {
    %c0_i32 = arith.constant 0 : i32
    %0 = arith.cmpi eq, %arg1, %c0_i32 : i32
    %1 = arith.extui %0 : i1 to i32
    %c0_i32_0 = arith.constant 0 : i32
    %2 = arith.cmpi ne, %1, %c0_i32_0 : i32
    scf.if %2 {
      %c0_10 = arith.constant 0 : index
      %c0_11 = arith.constant 0 : index
      %12 = vector.load %arg4[%c0_10, %c0_11] : memref<8x1xf32, #tpu.memory_space<vmem>>, vector<8x1xf32>
      %13 = vector.shape_cast %12 : vector<8x1xf32> to vector<8x1xf32>
      %14 = vector.broadcast %13 : vector<8x1xf32> to vector<8x512xf32>
      %c0_12 = arith.constant 0 : index
      %c0_13 = arith.constant 0 : index
      %15 = vector.load %arg6[%c0_12, %c0_13] : memref<8x512xf32, #tpu.memory_space<vmem>>, vector<8x512xf32>
      tpu.vector_store %arg6[%c0_12, %c0_13], %14 {strides = array<i32>} : memref<8x512xf32, #tpu.memory_space<vmem>>, vector<8x512xf32>,
    } else {
    }
    %c0 = arith.constant 0 : index
    %c0_1 = arith.constant 0 : index
    %3 = vector.load %arg6[%c0, %c0_1] : memref<8x512xf32, #tpu.memory_space<vmem>>, vector<8x512xf32>
    %c0_2 = arith.constant 0 : index
    %c0_3 = arith.constant 0 : index
    %4 = vector.load %arg2[%c0_2, %c0_3] : memref<8x36xbf16, #tpu.memory_space<vmem>>, vector<8x36xbf16>
    %c0_4 = arith.constant 0 : index
    %c0_5 = arith.constant 0 : index
    %5 = vector.load %arg3[%c0_4, %c0_5] : memref<36x512xbf16, #tpu.memory_space<vmem>>, vector<36x512xbf16>
    %cst = arith.constant dense<0.000000e+00> : vector<8x512xf32>
    %6 = tpu.matmul %4, %5, %cst {dimension_numbers = #tpu.dot_dimension_numbers<[1], [0], [0], [1], [0, 0, 1, 1], [], []>} : vector<8x36xbf16>, vector<36x512xbf16>, vector<8x512xf32> -> vector<8x512xf32>
    %7 = arith.addf %3, %6 : vector<8x512xf32>
    %c0_6 = arith.constant 0 : index
    %c0_7 = arith.constant 0 : index
    %8 = vector.load %arg6[%c0_6, %c0_7] : memref<8x512xf32, #tpu.memory_space<vmem>>, vector<8x512xf32>
    tpu.vector_store %arg6[%c0_6, %c0_7], %7 {strides = array<i32>} : memref<8x512xf32, #tpu.memory_space<vmem>>, vector<8x512xf32>,
    %c0_i32_8 = arith.constant 0 : i32
    %9 = arith.cmpi eq, %arg1, %c0_i32_8 : i32
    %10 = arith.extui %9 : i1 to i32
    %c0_i32_9 = arith.constant 0 : i32
    %11 = arith.cmpi ne, %10, %c0_i32_9 : i32
    scf.if %11 {
      %c0_10 = arith.constant 0 : index
      %c0_11 = arith.constant 0 : index
      %12 = vector.load %arg6[%c0_10, %c0_11] : memref<8x512xf32, #tpu.memory_space<vmem>>, vector<8x512xf32>
      %c0_12 = arith.constant 0 : index
      %c0_13 = arith.constant 0 : index
      %13 = vector.load %arg5[%c0_12, %c0_13] : memref<8x512xf32, #tpu.memory_space<vmem>>, vector<8x512xf32>
      tpu.vector_store %arg5[%c0_12, %c0_13], %12 {strides = array<i32>} : memref<8x512xf32, #tpu.memory_space<vmem>>, vector<8x512xf32>,
    } else {
    }
    return
  }
  func.func @transform_0(%arg0: i32, %arg1: i32) -> (i32, i32) {
    %c0_i32 = arith.constant 0 : i32
    %c0_i32_0 = arith.constant 0 : i32
    return %c0_i32, %arg1 : i32, i32
  }
  func.func @transform_1(%arg0: i32, %arg1: i32) -> (i32, i32) {
    %c0_i32 = arith.constant 0 : i32
    return %arg1, %arg0 : i32, i32
  }
  func.func @transform_2(%arg0: i32, %arg1: i32) -> (i32, i32) {
    %c0_i32 = arith.constant 0 : i32
    %c0_i32_0 = arith.constant 0 : i32
    %c0_i32_1 = arith.constant 0 : i32
    return %c0_i32, %c0_i32_0 : i32, i32
  }
  func.func @transform_3(%arg0: i32, %arg1: i32) -> (i32, i32) {
    %c0_i32 = arith.constant 0 : i32
    %c0_i32_0 = arith.constant 0 : i32
    return %c0_i32, %arg0 : i32, i32
  }
}

</mosaic_0001>

<bundles_post_ra>
// kernel: tpu_custom_call.1
= control target key start
LH: loop header
LB: loop body
LE: loop exit
PB: predicated region body
PF: predicated region fallthrough
CT: control target
= control target key end

     0   :  { %8 = vsyncpa [#allocation4], 0  ;;  %s359_s0 = inlined_call_operand.vmem [shape: bf16[8,36], index: 0, kind: input, shape index: {}]   ;;  %s360_s1 = inlined_call_operand.hbm [shape: bf16[36,512], index: 1, kind: input, shape index: {}]   ;;  %s361_s2 = inlined_call_operand.vmem [shape: f32[8,1], index: 2, kind: input, shape index: {}]   ;;  %s362_s3 = inlined_call_operand.hbm [shape: f32[8,512], index: 3, kind: output, shape index: {}]  }
   0x1   :  { %9 = vsyncpa [#allocation5], 0  ;;  %s16_s14 = sshll.u32 %s360_s1, 4  ;;  %s318_s15 = smov [#allocation3]   ;;  %s17_s14 = int_to_ptr.hbm [resolvable:$true] %s16_s14 }
   0x2   :  { %s18_s16 = sshll.u32 %s318_s15, 4  ;;  %s319_s17 = smov 256   ;;  %s19_s16 = int_to_ptr.vmem [resolvable:$true] %s18_s16 }
   0x3   :  { %s320_s18 = smov 16  }
   0x4   :  { %24 = dma.hbm_to_vmem [thread:$0]  %s17_s14, 1280, %s19_s16, [#allocation4], %s319_s17, %s319_s17, %s320_s18  }
   0x5   :  { %314 = dma.done.wait [#allocation4], 1280  }
   0x6   :  { %315 = vsyncadd [#allocation4], 4294966016  ;;  %v321_v0 = vmov 0   ;;  %v59_v1 = vld [vmem:[#allocation3 + $0x40] sm:$0x33]  ;;  %vm115_vm0 = vcmask 1041408  }
   0x7   :  { %265 = vset.pattern.permute.xlu0 %v321_v0  ;;  %v60_v2 = vld [vmem:[#allocation3 + $0x48] sm:$0x33]  ;;  %v87_v3 = vunpack.c.l.b16 %v59_v1  ;;  %v88_v4 = vunpack.c.h.b16 %v59_v1  ;;  %v234_v7 = vld [vmem:[#allocation3 + $0x20] sm:$0xf]  ;;  %v258_v8 = vld [vmem:[#allocation3 + $0x2c] sm:$0xf0] }
   0x8   :  { %v89_v5 = vunpack.c.l.b16 %v60_v2  ;;  %v90_v6 = vunpack.c.h.b16 %v60_v2  ;;  %v256_v13 = vld [vmem:[#allocation3 + $0x24] sm:$0xf]  ;;  %v236_v14 = vld [vmem:[#allocation3 + $0x30] sm:$0xf0]  ;;  %v242_v15 = vld [vmem:[#allocation3 + $0x28] sm:$0xf]  ;;  %v235_v23 = vor.u32 %v258_v8, %v234_v7 }
   0x9   :  { %v99_v9 = vpack.c.b16 %v87_v3, %v87_v3  ;;  %v100_v10 = vpack.c.b16 %v88_v4, %v88_v4  ;;  %v259_v16 = vld [vmem:[#allocation3 + $0x34] sm:$0xf0]  ;;  %v257_v17 = vld [vmem:[#allocation3 + $0x2c] sm:$0xf]  ;;  %v244_v18 = vld [vmem:[#allocation3 + $0x38] sm:$0xf0]  ;;  %v239_v24 = vor.u32 %v256_v13, %v236_v14 }
   0xa   :  { %v101_v11 = vpack.c.b16 %v89_v5, %v89_v5  ;;  %v102_v12 = vpack.c.b16 %v90_v6, %v90_v6  ;;  %v218_v25 = vld [vmem:[#allocation3] sm:$0xf]  ;;  %v254_v26 = vld [vmem:[#allocation3 + $0xc] sm:$0xf0]  ;;  %v252_v27 = vld [vmem:[#allocation3 + $0x4] sm:$0xf]  ;;  %v243_v28 = vor.u32 %v259_v16, %v242_v15  ;;  %v247_v29 = vor.u32 %v257_v17, %v244_v18 }
   0xb   :  { %v117_v19 = vsel %vm115_vm0, %v99_v9, 0  ;;  %v120_v20 = vsel %vm115_vm0, %v100_v10, 0  ;;  %v220_v30 = vld [vmem:[#allocation3 + $0x10] sm:$0xf0]  ;;  %v226_v31 = vld [vmem:[#allocation3 + $0x8] sm:$0xf]  ;;  %v219_v36 = vor.u32 %v254_v26, %v218_v25 }
   0xc   :  { %v123_v21 = vsel %vm115_vm0, %v101_v11, 0  ;;  %v126_v22 = vsel %vm115_vm0, %v102_v12, 0  ;;  %133 = vmatpush.bf16.msra.mxu0 %v117_v19  ;;  %146 = vmatpush.bf16.msra.mxu1 %v120_v20  ;;  %v36_v32 = vld [vmem:[%s361_s2] sm:$0xff]  ;;  %v255_v33 = vld [vmem:[#allocation3 + $0x14] sm:$0xf0]  ;;  %v223_v37 = vor.u32 %v252_v27, %v220_v30  ;;  %vm111_vm1 = vcmask 293888  }
   0xd   :  { %159 = vmatpush.bf16.msra.mxu2 %v123_v21  ;;  %172 = vmatpush.bf16.msra.mxu3 %v126_v22  ;;  %v253_v34 = vld [vmem:[#allocation3 + $0xc] sm:$0xf]  ;;  %v228_v35 = vld [vmem:[#allocation3 + $0x18] sm:$0xf0]  ;;  %v227_v38 = vor.u32 %v255_v33, %v226_v31  ;;  %v50_v40 = vld [vmem:[%s359_s0] sm:$0xf] }
   0xe   :  { %39 = vperm.xlu0 %265, %v36_v32   ;;  %v231_v39 = vor.u32 %v253_v34, %v228_v35  ;;  %s322_s2 = smov [#allocation6]   ;;  %s206_s0 = sshll.u32 %s362_s3, 4  ;;  %s207_s0 = int_to_ptr.hbm [resolvable:$true] %s206_s0 }
   0xf   :  { %s204_s22 = sshll.u32 %s322_s2, 4  ;;  %s205_s22 = int_to_ptr.vmem [resolvable:$true] %s204_s22 }
  0x10   :  { %134 = vmatpush.bf16.msra.mxu0 %v235_v23  ;;  %147 = vmatpush.bf16.msra.mxu1 %v239_v24 }
  0x11   :  { %160 = vmatpush.bf16.msra.mxu2 %v243_v28  ;;  %173 = vmatpush.bf16.msra.mxu3 %v247_v29 }
  0x14   :  { %135 = vmatpush.bf16.msra.mxu0 %v219_v36  ;;  %148 = vmatpush.bf16.msra.mxu1 %v223_v37 }
  0x15   :  { %161 = vmatpush.bf16.msra.mxu2 %v227_v38  ;;  %174 = vmatpush.bf16.msra.mxu3 %v231_v39 }
  0x17   :  { %248 = vmatmul.msk.bf16.vlgmr.msra.gmra.mxu0 %vm111_vm1, %v50_v40  ;;  %249 = vmatmul.msk.bf16.vlgmr.msra.gmra.mxu1 %vm111_vm1, %v50_v40 }
  0x18   :  { %250 = vmatmul.msk.bf16.vlgmr.msra.gmra.mxu2 %vm111_vm1, %v50_v40  ;;  %251 = vmatmul.msk.bf16.vlgmr.msra.gmra.mxu3 %vm111_vm1, %v50_v40 }
  0x80   :  { %v40_v41 = vpop.permute.xlu0 %39 }
  0x94   :  { %v137_v42 = vpop.f32.mrf.mxu0  ;;  %v150_v43 = vpop.f32.mrf.mxu1 }
  0x95   :  { %v180_v44 = vadd.f32 %v137_v42, %v40_v41  ;;  %v181_v45 = vadd.f32 %v150_v43, %v40_v41 }
  0x97   :  { %195 = vst [vmem:[#allocation6] sm:$0xff] %v180_v44 }
  0x98   :  { %196 = vst [vmem:[#allocation6 + $0x8] sm:$0xff] %v181_v45 }
  0x9b   :  { %v163_v46 = vpop.f32.mrf.mxu2  ;;  %v176_v47 = vpop.f32.mrf.mxu3 }
  0x9c   :  { %v182_v48 = vadd.f32 %v163_v46, %v40_v41  ;;  %v183_v49 = vadd.f32 %v176_v47, %v40_v41  ;;  %v139_v50 = vpop.f32.mrf.mxu0  ;;  %v152_v51 = vpop.f32.mrf.mxu1 }
  0x9e   :  { %197 = vst [vmem:[#allocation6 + $0x10] sm:$0xff] %v182_v48 }
  0x9f   :  { %198 = vst [vmem:[#allocation6 + $0x18] sm:$0xff] %v183_v49 }
  0xa0   :  { %209 = dma.vmem_to_hbm [thread:$0]  %s205_s22, 512, %s207_s0, [#allocation5]  }
  0xa3   :  { %v165_v52 = vpop.f32.mrf.mxu2  ;;  %v178_v53 = vpop.f32.mrf.mxu3 }
  0xa4   :  { %316 = dma.done.wait [#allocation5], 512  }
  0xa5   :  { %317 = vsyncadd [#allocation5], 4294966784 }
  0xa6   :  { %214 = vsyncpa [#allocation4], 1 }
  0xa7   :  { %215 = vsyncpa [#allocation5], 1 }

</bundles_post_ra>
